<compile_context>
chip_gen: v7x
topology: tpu7x:2x2x1
jax: 0.10.0
libtpu: 0.0.40
codegen_flags: <defaults>
</compile_context>

<pallas_src>
import jax
import jax.numpy as jnp
from jax.experimental import pallas as pl
from jax.experimental.pallas import tpu as pltpu


def _round_up(n, m):
    return ((n + m - 1) // m) * m


def _make_kernel(action_dim):
    A = action_dim

    def kernel(xt_ref, p1_ref, p2_ref, out_ref):
        # xt_ref:  (SP, Bb)   rows [0:S) = x^T, row S = 1.0 (bias), rest 0
        # p1_ref:  (H2E, SP)  [W1a^T | b1a ; W1c^T | b1c ; const-1 row ; 0-pad]
        # p2_ref:  (R, H2E)   rows [0:A) = Wa^T (+ba col), row A = Wc^T (+bc), rest 0
        # out_ref: (R, Bb)    rows [0:A) = action probs, row A = value, rest 0

        # Layer 1: fused actor|critic, bias folded in.  K = SP (tiny) -> the
        # otherwise-idle MXU does it essentially for free.
        h = jnp.dot(p1_ref[...], xt_ref[...],
                    preferred_element_type=jnp.float32)        # (H2E, Bb)
        h = jnp.maximum(h, 0.0)

        # Both heads: one tiny-M MXU dot producing the lane-dense output slab.
        head = jnp.dot(p2_ref[...], h,
                       preferred_element_type=jnp.float32)     # (R, Bb)

        # Numerically-stable, exact softmax over the A logit rows (statically
        # unrolled; pure elementwise work, batch stays in the lane dimension).
        row = jax.lax.broadcasted_iota(jnp.int32, head.shape, 0)
        is_logit = row < A
        m = head[0:1, :]
        for j in range(1, A):
            m = jnp.maximum(m, head[j:j + 1, :])               # (1, Bb)
        e = jnp.exp(jnp.where(is_logit, head, m) - m)          # (R, Bb)
        denom = e[0:1, :]
        for j in range(1, A):
            denom = denom + e[j:j + 1, :]
        probs = e * (1.0 / denom)                              # exact reciprocal

        out_ref[...] = jnp.where(is_logit, probs,
                                 jnp.where(row == A, head, 0.0))

    return kernel


def actor_critic_forward(x, p1, p2, *, action_dim):
    """x: (B, S) float32; p1/p2 from pack_params.

    Returns (action_probs (B, A), state_value (B, 1)) — same semantics as the
    PyTorch module's forward.
    """
    B, S = x.shape
    H2E, SP = p1.shape
    R = p2.shape[0]
    assert p2.shape == (R, H2E)
    assert S + 1 <= SP and action_dim + 1 <= R

    # Batch block: big enough to amortize per-grid-step overhead, multiple of
    # 128 lanes, capped at 2048 (safe on v7x's smaller VMEM), shrinks for tiny B.
    block_b = min(2048, _round_up(max(B, 1), 128))
    B_pad = _round_up(max(B, 1), block_b)

    # Batch-in-lanes layout: lane-dense (SP, B_pad) slab with a constant-1 row
    # so all biases are folded into the packed weight matmuls.
    xt = jnp.zeros((SP, B_pad), jnp.float32)
    xt = xt.at[:S, :B].set(x.T.astype(jnp.float32))
    xt = xt.at[S, :].set(1.0)

    out = pl.pallas_call(
        _make_kernel(action_dim),
        out_shape=jax.ShapeDtypeStruct((R, B_pad), jnp.float32),
        grid_spec=pltpu.PrefetchScalarGridSpec(
            num_scalar_prefetch=0,
            grid=(B_pad // block_b,),
            in_specs=[
                pl.BlockSpec((SP, block_b), lambda i: (0, i)),
                pl.BlockSpec(p1.shape, lambda i: (0, 0)),   # weights stay resident
                pl.BlockSpec(p2.shape, lambda i: (0, 0)),
            ],
            out_specs=pl.BlockSpec((R, block_b), lambda i: (0, i)),
        ),
        compiler_params=pltpu.CompilerParams(
            dimension_semantics=("parallel",),
            vmem_limit_bytes=32 * 1024 * 1024,
        ),
    )(xt, p1, p2)

    # Cheap row slices off the narrow (R, B_pad) slab.
    probs = out[:action_dim, :B].T                   # (B, A)
    value = out[action_dim, :B][:, None]             # (B, 1)
    return probs, value


def init_params(key, state_dim, hidden, action_dim):
    ks = jax.random.split(key, 8)
    scale = 0.1
    w1a = scale * jax.random.normal(ks[0], (state_dim, hidden), jnp.float32)
    b1a = scale * jax.random.normal(ks[1], (hidden,), jnp.float32)
    w1c = scale * jax.random.normal(ks[2], (state_dim, hidden), jnp.float32)
    b1c = scale * jax.random.normal(ks[3], (hidden,), jnp.float32)
    wa = scale * jax.random.normal(ks[4], (hidden, action_dim), jnp.float32)
    ba = scale * jax.random.normal(ks[5], (action_dim,), jnp.float32)
    wc = scale * jax.random.normal(ks[6], (hidden, 1), jnp.float32)
    bc = scale * jax.random.normal(ks[7], (1,), jnp.float32)
    return (w1a, b1a, w1c, b1c, wa, ba, wc, bc)


def pack_params(params):
    """Pack the 8 PyTorch-layout tensors into 2 transposed kernel buffers with
    all biases folded in (constant-1 input row / constant-1 hidden unit)."""
    (w1a, b1a, w1c, b1c, wa, ba, wc, bc) = params
    state_dim, hidden = w1a.shape
    action_dim = wa.shape[1]
    SP = _round_up(state_dim + 1, 8)          # feature rows incl. the 1s row
    H2E = _round_up(2 * hidden + 1, 8)        # hidden rows incl. the const-1 unit
    R = _round_up(action_dim + 1, 8)          # output slab rows

    # p1: (H2E, SP); relu(p1 @ xt) = [actor hidden ; critic hidden ; 1 ; 0...].
    p1 = jnp.zeros((H2E, SP), jnp.float32)
    p1 = p1.at[:hidden, :state_dim].set(w1a.T)
    p1 = p1.at[:hidden, state_dim].set(b1a.reshape(-1))
    p1 = p1.at[hidden:2 * hidden, :state_dim].set(w1c.T)
    p1 = p1.at[hidden:2 * hidden, state_dim].set(b1c.reshape(-1))
    p1 = p1.at[2 * hidden, state_dim].set(1.0)           # const-1 hidden unit

    # p2: (R, H2E); p2 @ h -> rows [0:A) = logits, row A = value (biases folded).
    p2 = jnp.zeros((R, H2E), jnp.float32)
    p2 = p2.at[:action_dim, :hidden].set(wa.T)
    p2 = p2.at[action_dim, hidden:2 * hidden].set(wc.reshape(-1))
    p2 = p2.at[:action_dim, 2 * hidden].set(ba.reshape(-1))
    p2 = p2.at[action_dim, 2 * hidden].set(bc.reshape(-1)[0])
    return p1, p2


def reference_forward(x, params):
    (w1a, b1a, w1c, b1c, wa, ba, wc, bc) = params
    ha = jnp.maximum(x @ w1a + b1a, 0.0)
    hc = jnp.maximum(x @ w1c + b1c, 0.0)
    probs = jax.nn.softmax(ha @ wa + ba, axis=-1)
    value = hc @ wc + bc
    return probs, value


if __name__ == "__main__":
    # Blackjack: observation is a 3-tuple, action space has 2 actions.
    state_dim = 3
    action_dim = 2
    hidden = 128
    batch = 8

    key = jax.random.PRNGKey(0)
    k_params, k_x = jax.random.split(key)
    params = init_params(k_params, state_dim, hidden, action_dim)
    p1, p2 = pack_params(params)
    x = jax.random.normal(k_x, (batch, state_dim), jnp.float32)

    fwd = jax.jit(actor_critic_forward, static_argnames=("action_dim",))
    probs, value = fwd(x, p1, p2, action_dim=action_dim)
    jax.block_until_ready((probs, value))

    ref_probs, ref_value = reference_forward(x, params)
    assert probs.shape == (batch, action_dim)
    assert value.shape == (batch, 1)
    assert jnp.allclose(probs, ref_probs, atol=1e-4, rtol=1e-4)
    assert jnp.allclose(value, ref_value, atol=1e-4, rtol=1e-4)
    assert jnp.allclose(jnp.sum(probs, axis=-1), 1.0, atol=1e-5)

    print("KERNEL_OK")
</pallas_src>

<mosaic_0001>
module attributes {stable_mosaic.version = 11 : i64} {
  func.func @kernel(%arg0: i32, %arg1: memref<8x128xf32, #tpu.memory_space<vmem>>, %arg2: memref<264x8xf32, #tpu.memory_space<vmem>>, %arg3: memref<8x264xf32, #tpu.memory_space<vmem>>, %arg4: memref<8x128xf32, #tpu.memory_space<vmem>>) attributes {dimension_semantics = [#tpu.dimension_semantics<parallel>], iteration_bounds = array<i64: 1>, scalar_prefetch = 0 : i64, scratch_operands = 0 : i64, tpu.core_type = #tpu.core_type<tc>, window_params = [{transform_indices = @transform_0, window_bounds = array<i64: 8, 128>}, {pipeline_mode = #tpu.pipeline_mode<synchronous>, transform_indices = @transform_1, window_bounds = array<i64: 264, 8>}, {pipeline_mode = #tpu.pipeline_mode<synchronous>, transform_indices = @transform_2, window_bounds = array<i64: 8, 264>}, {transform_indices = @transform_3, window_bounds = array<i64: 8, 128>}]} {
    %c0 = arith.constant 0 : index
    %c0_0 = arith.constant 0 : index
    %0 = vector.load %arg2[%c0, %c0_0] : memref<264x8xf32, #tpu.memory_space<vmem>>, vector<264x8xf32>
    %c0_1 = arith.constant 0 : index
    %c0_2 = arith.constant 0 : index
    %1 = vector.load %arg1[%c0_1, %c0_2] : memref<8x128xf32, #tpu.memory_space<vmem>>, vector<8x128xf32>
    %cst = arith.constant dense<0.000000e+00> : vector<264x128xf32>
    %2 = tpu.matmul %0, %1, %cst {dimension_numbers = #tpu.dot_dimension_numbers<[1], [0], [0], [1], [0, 0, 1, 1], [], []>} : vector<264x8xf32>, vector<8x128xf32>, vector<264x128xf32> -> vector<264x128xf32>
    %cst_3 = arith.constant 0.000000e+00 : f32
    %3 = vector.broadcast %cst_3 : f32 to vector<264x128xf32>
    %4 = arith.maximumf %2, %3 : vector<264x128xf32>
    %c0_4 = arith.constant 0 : index
    %c0_5 = arith.constant 0 : index
    %5 = vector.load %arg3[%c0_4, %c0_5] : memref<8x264xf32, #tpu.memory_space<vmem>>, vector<8x264xf32>
    %cst_6 = arith.constant dense<0.000000e+00> : vector<8x128xf32>
    %6 = tpu.matmul %5, %4, %cst_6 {dimension_numbers = #tpu.dot_dimension_numbers<[1], [0], [0], [1], [0, 0, 1, 1], [], []>} : vector<8x264xf32>, vector<264x128xf32>, vector<8x128xf32> -> vector<8x128xf32>
    %7 = tpu.iota {dimensions = array<i32: 0>} : vector<8x128xi32>
    %c2_i32 = arith.constant 2 : i32
    %8 = vector.broadcast %c2_i32 : i32 to vector<8x128xi32>
    %9 = arith.cmpi slt, %7, %8 : vector<8x128xi32>
    %10 = vector.extract_strided_slice %6 {offsets = [0, 0], sizes = [1, 128], strides = [1, 1]} : vector<8x128xf32> to vector<1x128xf32>
    %11 = vector.extract_strided_slice %6 {offsets = [1, 0], sizes = [1, 128], strides = [1, 1]} : vector<8x128xf32> to vector<1x128xf32>
    %12 = arith.maximumf %10, %11 : vector<1x128xf32>
    %13 = vector.shape_cast %12 : vector<1x128xf32> to vector<1x128xf32>
    %14 = vector.broadcast %13 : vector<1x128xf32> to vector<8x128xf32>
    %15 = arith.select %9, %6, %14 : vector<8x128xi1>, vector<8x128xf32>
    %16 = vector.broadcast %12 : vector<1x128xf32> to vector<8x128xf32>
    %17 = arith.subf %15, %16 : vector<8x128xf32>
    %18 = math.exp %17 : vector<8x128xf32>
    %19 = vector.extract_strided_slice %18 {offsets = [0, 0], sizes = [1, 128], strides = [1, 1]} : vector<8x128xf32> to vector<1x128xf32>
    %20 = vector.extract_strided_slice %18 {offsets = [1, 0], sizes = [1, 128], strides = [1, 1]} : vector<8x128xf32> to vector<1x128xf32>
    %21 = arith.addf %19, %20 : vector<1x128xf32>
    %cst_7 = arith.constant 1.000000e+00 : f32
    %22 = vector.broadcast %cst_7 : f32 to vector<1x128xf32>
    %23 = arith.divf %22, %21 : vector<1x128xf32>
    %24 = vector.broadcast %23 : vector<1x128xf32> to vector<8x128xf32>
    %25 = arith.mulf %18, %24 : vector<8x128xf32>
    %c2_i32_8 = arith.constant 2 : i32
    %26 = vector.broadcast %c2_i32_8 : i32 to vector<8x128xi32>
    %27 = arith.cmpi eq, %7, %26 : vector<8x128xi32>
    %cst_9 = arith.constant 0.000000e+00 : f32
    %28 = vector.broadcast %cst_9 : f32 to vector<8x128xf32>
    %29 = arith.select %27, %6, %28 : vector<8x128xi1>, vector<8x128xf32>
    %30 = arith.select %9, %25, %29 : vector<8x128xi1>, vector<8x128xf32>
    %c0_10 = arith.constant 0 : index
    %c0_11 = arith.constant 0 : index
    %31 = vector.load %arg4[%c0_10, %c0_11] : memref<8x128xf32, #tpu.memory_space<vmem>>, vector<8x128xf32>
    tpu.vector_store %arg4[%c0_10, %c0_11], %30 {strides = array<i32>} : memref<8x128xf32, #tpu.memory_space<vmem>>, vector<8x128xf32>,
    return
  }
  func.func @transform_0(%arg0: i32) -> (i32, i32) {
    %c0_i32 = arith.constant 0 : i32
    %c0_i32_0 = arith.constant 0 : i32
    return %c0_i32, %arg0 : i32, i32
  }
  func.func @transform_1(%arg0: i32) -> (i32, i32) {
    %c0_i32 = arith.constant 0 : i32
    %c0_i32_0 = arith.constant 0 : i32
    %c0_i32_1 = arith.constant 0 : i32
    return %c0_i32, %c0_i32_0 : i32, i32
  }
  func.func @transform_2(%arg0: i32) -> (i32, i32) {
    %c0_i32 = arith.constant 0 : i32
    %c0_i32_0 = arith.constant 0 : i32
    %c0_i32_1 = arith.constant 0 : i32
    return %c0_i32, %c0_i32_0 : i32, i32
  }
  func.func @transform_3(%arg0: i32) -> (i32, i32) {
    %c0_i32 = arith.constant 0 : i32
    %c0_i32_0 = arith.constant 0 : i32
    return %c0_i32, %arg0 : i32, i32
  }
}

</mosaic_0001>

<bundles_post_ra>
// kernel: actor_critic_forward.1
= control target key start
LH: loop header
LB: loop body
LE: loop exit
PB: predicated region body
PF: predicated region fallthrough
CT: control target
= control target key end

     0   :  { %vm48_vm0 = vcmask 64512   ;;  %v842_v0 = vmov 0.0   ;;  %vm843_vm1 = vmmov 0   ;;  %s1109_s0 = inlined_call_operand.vmem [shape: f32[8,128], index: 0, kind: input, shape index: {}]   ;;  %s1110_s1 = inlined_call_operand.vmem [shape: f32[264,8], index: 1, kind: input, shape index: {}]   ;;  %s1111_s2 = inlined_call_operand.vmem [shape: f32[8,264], index: 2, kind: input, shape index: {}]   ;;  %s1112_s3 = inlined_call_operand.vmem [shape: f32[8,128], index: 3, kind: output, shape index: {}]  }
   0x1   :  { %696 = vmatprep.subr.mxu0 %v842_v0  ;;  %v47_v1 = vld [vmem:[%s1109_s0] sm:$0xff]  ;;  %698 = vmatprep.mubr.msk.f32.mxu0 %vm843_vm1, %v842_v0  ;;  %v15_v3 = vld [vmem:[%s1110_s1 + $0x8] sm:$0xff]  ;;  %v32_v4 = vld [vmem:[%s1110_s1 + $0x90] sm:$0xff] }
   0x2   :  { %v14_v2 = vld [vmem:[%s1110_s1] sm:$0xff]  ;;  %697 = vmatpush3.msra.mxu0 %v47_v1  ;;  %834 = vmatprep.subr.mxu1 %v842_v0  ;;  %v33_v5 = vld [vmem:[%s1110_s1 + $0x98] sm:$0xff]  ;;  %v16_v6 = vld [vmem:[%s1110_s1 + $0x10] sm:$0xff] }
   0x3   :  { %699 = vmatmul.mubr.msk.f32.vlgmr.msra.gmra.mrb[0].mxu0 %vm48_vm0, %v14_v2  ;;  %835 = vmatpush3.msra.mxu1 %v47_v1  ;;  %v34_v7 = vld [vmem:[%s1110_s1 + $0xa0] sm:$0xff]  ;;  %v17_v8 = vld [vmem:[%s1110_s1 + $0x18] sm:$0xff]  ;;  %v35_v9 = vld [vmem:[%s1110_s1 + $0xa8] sm:$0xff] }
   0x4   :  { %701 = vmatprep.mubr.msk.f32.mxu0 %vm843_vm1, %v842_v0  ;;  %752 = vmatprep.mubr.msk.f32.mxu1 %vm843_vm1, %v842_v0  ;;  %v18_v10 = vld [vmem:[%s1110_s1 + $0x20] sm:$0xff]  ;;  %v36_v11 = vld [vmem:[%s1110_s1 + $0xb0] sm:$0xff]  ;;  %v19_v12 = vld [vmem:[%s1110_s1 + $0x28] sm:$0xff] }
   0x5   :  { %753 = vmatmul.mubr.msk.f32.vlgmr.msra.gmra.mrb[0].mxu1 %vm48_vm0, %v32_v4  ;;  %v37_v13 = vld [vmem:[%s1110_s1 + $0xb8] sm:$0xff]  ;;  %v20_v14 = vld [vmem:[%s1110_s1 + $0x30] sm:$0xff]  ;;  %v38_v15 = vld [vmem:[%s1110_s1 + $0xc0] sm:$0xff] }
   0x6   :  { %755 = vmatprep.mubr.msk.f32.mxu1 %vm843_vm1, %v842_v0  ;;  %v21_v16 = vld [vmem:[%s1110_s1 + $0x38] sm:$0xff]  ;;  %v39_v17 = vld [vmem:[%s1110_s1 + $0xc8] sm:$0xff]  ;;  %v22_v18 = vld [vmem:[%s1110_s1 + $0x40] sm:$0xff] }
   0x7   :  { %702 = vmatmul.mubr.msk.f32.gmra.mrb[2].mxu0 %vm48_vm0, %v15_v3  ;;  %v40_v19 = vld [vmem:[%s1110_s1 + $0xd0] sm:$0xff]  ;;  %v23_v20 = vld [vmem:[%s1110_s1 + $0x48] sm:$0xff]  ;;  %v41_v21 = vld [vmem:[%s1110_s1 + $0xd8] sm:$0xff] }
   0x8   :  { %704 = vmatprep.mubr.msk.f32.mxu0 %vm843_vm1, %v842_v0  ;;  %v24_v22 = vld [vmem:[%s1110_s1 + $0x50] sm:$0xff]  ;;  %v42_v23 = vld [vmem:[%s1110_s1 + $0xe0] sm:$0xff]  ;;  %v25_v24 = vld [vmem:[%s1110_s1 + $0x58] sm:$0xff] }
   0x9   :  { %756 = vmatmul.mubr.msk.f32.gmra.mrb[2].mxu1 %vm48_vm0, %v33_v5  ;;  %v43_v25 = vld [vmem:[%s1110_s1 + $0xe8] sm:$0xff]  ;;  %v26_v26 = vld [vmem:[%s1110_s1 + $0x60] sm:$0xff]  ;;  %v44_v27 = vld [vmem:[%s1110_s1 + $0xf0] sm:$0xff] }
   0xa   :  { %758 = vmatprep.mubr.msk.f32.mxu1 %vm843_vm1, %v842_v0  ;;  %v27_v28 = vld [vmem:[%s1110_s1 + $0x68] sm:$0xff]  ;;  %v45_v29 = vld [vmem:[%s1110_s1 + $0xf8] sm:$0xff]  ;;  %v28_v30 = vld [vmem:[%s1110_s1 + $0x70] sm:$0xff] }
   0xb   :  { %705 = vmatmul.mubr.msk.f32.gmra.mrb[4].mxu0 %vm48_vm0, %v16_v6  ;;  %v46_v31 = vld [vmem:[%s1110_s1 + $0x100] sm:$0xff]  ;;  %v29_v32 = vld [vmem:[%s1110_s1 + $0x78] sm:$0xff]  ;;  %v31_v34 = vld [vmem:[%s1110_s1 + $0x88] sm:$0xff] }
   0xc   :  { %707 = vmatprep.mubr.msk.f32.mxu0 %vm843_vm1, %v842_v0  ;;  %v30_v33 = vld [vmem:[%s1110_s1 + $0x80] sm:$0xff]  ;;  %v412_v35 = vld [vmem:[%s1111_s2 + $0x8] sm:$0xff] }
   0xd   :  { %759 = vmatmul.mubr.msk.f32.gmra.mrb[4].mxu1 %vm48_vm0, %v34_v7 }
   0xe   :  { %761 = vmatprep.mubr.msk.f32.mxu1 %vm843_vm1, %v842_v0 }
   0xf   :  { %708 = vmatmul.mubr.msk.f32.gmra.mrb[6].mxu0 %vm48_vm0, %v17_v8 }
  0x10   :  { %710 = vmatprep.mubr.msk.f32.mxu0 %vm843_vm1, %v842_v0 }
  0x11   :  { %762 = vmatmul.mubr.msk.f32.gmra.mrb[6].mxu1 %vm48_vm0, %v35_v9 }
  0x12   :  { %764 = vmatprep.mubr.msk.f32.mxu1 %vm843_vm1, %v842_v0 }
  0x13   :  { %711 = vmatmul.mubr.msk.f32.gmra.mrb[8].mxu0 %vm48_vm0, %v18_v10 }
  0x14   :  { %713 = vmatprep.mubr.msk.f32.mxu0 %vm843_vm1, %v842_v0 }
  0x15   :  { %765 = vmatmul.mubr.msk.f32.gmra.mrb[8].mxu1 %vm48_vm0, %v36_v11 }
  0x16   :  { %767 = vmatprep.mubr.msk.f32.mxu1 %vm843_vm1, %v842_v0 }
  0x17   :  { %714 = vmatmul.mubr.msk.f32.gmra.mrb[10].mxu0 %vm48_vm0, %v19_v12 }
  0x18   :  { %716 = vmatprep.mubr.msk.f32.mxu0 %vm843_vm1, %v842_v0 }
  0x19   :  { %768 = vmatmul.mubr.msk.f32.gmra.mrb[10].mxu1 %vm48_vm0, %v37_v13 }
  0x1a   :  { %770 = vmatprep.mubr.msk.f32.mxu1 %vm843_vm1, %v842_v0 }
  0x1b   :  { %717 = vmatmul.mubr.msk.f32.gmra.mrb[12].mxu0 %vm48_vm0, %v20_v14 }
  0x1c   :  { %719 = vmatprep.mubr.msk.f32.mxu0 %vm843_vm1, %v842_v0 }
  0x1d   :  { %771 = vmatmul.mubr.msk.f32.gmra.mrb[12].mxu1 %vm48_vm0, %v38_v15 }
  0x1e   :  { %773 = vmatprep.mubr.msk.f32.mxu1 %vm843_vm1, %v842_v0 }
  0x1f   :  { %720 = vmatmul.mubr.msk.f32.gmra.mrb[14].mxu0 %vm48_vm0, %v21_v16 }
  0x20   :  { %722 = vmatprep.mubr.msk.f32.mxu0 %vm843_vm1, %v842_v0 }
  0x21   :  { %774 = vmatmul.mubr.msk.f32.gmra.mrb[14].mxu1 %vm48_vm0, %v39_v17 }
  0x22   :  { %776 = vmatprep.mubr.msk.f32.mxu1 %vm843_vm1, %v842_v0 }
  0x23   :  { %723 = vmatmul.mubr.msk.f32.gmra.mrb[16].mxu0 %vm48_vm0, %v22_v18 }
  0x24   :  { %725 = vmatprep.mubr.msk.f32.mxu0 %vm843_vm1, %v842_v0 }
  0x25   :  { %777 = vmatmul.mubr.msk.f32.gmra.mrb[16].mxu1 %vm48_vm0, %v40_v19 }
  0x26   :  { %779 = vmatprep.mubr.msk.f32.mxu1 %vm843_vm1, %v842_v0 }
  0x27   :  { %726 = vmatmul.mubr.msk.f32.gmra.mrb[18].mxu0 %vm48_vm0, %v23_v20 }
  0x28   :  { %728 = vmatprep.mubr.msk.f32.mxu0 %vm843_vm1, %v842_v0 }
  0x29   :  { %780 = vmatmul.mubr.msk.f32.gmra.mrb[18].mxu1 %vm48_vm0, %v41_v21 }
  0x2a   :  { %782 = vmatprep.mubr.msk.f32.mxu1 %vm843_vm1, %v842_v0 }
  0x2b   :  { %729 = vmatmul.mubr.msk.f32.gmra.mrb[20].mxu0 %vm48_vm0, %v24_v22 }
  0x2c   :  { %731 = vmatprep.mubr.msk.f32.mxu0 %vm843_vm1, %v842_v0 }
  0x2d   :  { %783 = vmatmul.mubr.msk.f32.gmra.mrb[20].mxu1 %vm48_vm0, %v42_v23 }
  0x2e   :  { %785 = vmatprep.mubr.msk.f32.mxu1 %vm843_vm1, %v842_v0 }
  0x2f   :  { %732 = vmatmul.mubr.msk.f32.gmra.mrb[22].mxu0 %vm48_vm0, %v25_v24 }
  0x30   :  { %734 = vmatprep.mubr.msk.f32.mxu0 %vm843_vm1, %v842_v0 }
  0x31   :  { %786 = vmatmul.mubr.msk.f32.gmra.mrb[22].mxu1 %vm48_vm0, %v43_v25 }
  0x32   :  { %788 = vmatprep.mubr.msk.f32.mxu1 %vm843_vm1, %v842_v0 }
  0x33   :  { %735 = vmatmul.mubr.msk.f32.gmra.mrb[24].mxu0 %vm48_vm0, %v26_v26 }
  0x34   :  { %737 = vmatprep.mubr.msk.f32.mxu0 %vm843_vm1, %v842_v0 }
  0x35   :  { %789 = vmatmul.mubr.msk.f32.gmra.mrb[24].mxu1 %vm48_vm0, %v44_v27 }
  0x36   :  { %791 = vmatprep.mubr.msk.f32.mxu1 %vm843_vm1, %v842_v0 }
  0x37   :  { %738 = vmatmul.mubr.msk.f32.gmra.mrb[26].mxu0 %vm48_vm0, %v27_v28 }
  0x38   :  { %740 = vmatprep.mubr.msk.f32.mxu0 %vm843_vm1, %v842_v0 }
  0x39   :  { %792 = vmatmul.mubr.msk.f32.gmra.mrb[26].mxu1 %vm48_vm0, %v45_v29 }
  0x3a   :  { %794 = vmatprep.mubr.msk.f32.mxu1 %vm843_vm1, %v842_v0 }
  0x3b   :  { %741 = vmatmul.mubr.msk.f32.gmra.mrb[28].mxu0 %vm48_vm0, %v28_v30 }
  0x3c   :  { %743 = vmatprep.mubr.msk.f32.mxu0 %vm843_vm1, %v842_v0 }
  0x3d   :  { %795 = vmatmul.mubr.msk.f32.gmra.mrb[28].mxu1 %vm48_vm0, %v46_v31 }
  0x3e   :  { %481 = vmatprep.mubr.f32.mxu1 %v412_v35 }
  0x3f   :  { %744 = vmatmul.mubr.msk.f32.gmra.mrb[30].mxu0 %vm48_vm0, %v29_v32 }
  0x40   :  { %746 = vmatprep.mubr.msk.f32.mxu0 %vm843_vm1, %v842_v0 }
  0x43   :  { %747 = vmatmul.mubr.msk.f32.gmra.mrb[32].mxu0 %vm48_vm0, %v30_v33 }
  0x44   :  { %749 = vmatprep.mubr.msk.f32.mxu0 %vm843_vm1, %v842_v0 }
  0x47   :  { %750 = vmatmul.mubr.msk.f32.gmra.mrb[34].mxu0 %vm48_vm0, %v31_v34 }
  0xd6   :  { %v214_v36 = vpop.f32.mrb[0].mxu0 }
  0xd7   :  { %v700_v37 = vpop.f32.mrb[1].mxu0  ;;  %v378_v41 = vmax.f32 %v214_v36, 0.0 }
  0xd8   :  { %v304_v38 = vpop.f32.mrb[0].mxu1 }
  0xd9   :  { %v754_v40 = vpop.f32.mrb[1].mxu1  ;;  %v396_v44 = vmax.f32 %v304_v38, 0.0 }
  0xda   :  { %v219_v39 = vpop.f32.mrb[2].mxu0 }
  0xdb   :  { %v379_v42 = vmax.f32 %v219_v39, 0.0  ;;  %v703_v43 = vpop.f32.mrb[3].mxu0 }
  0xdc   :  { %v309_v46 = vpop.f32.mrb[2].mxu1 }
  0xdd   :  { %v1070_v45 = vpack.c.bf16 %v379_v42, %v378_v41  ;;  %v397_v48 = vmax.f32 %v309_v46, 0.0  ;;  %v757_v49 = vpop.f32.mrb[3].mxu1 }
  0xde   :  { %v224_v47 = vpop.f32.mrb[4].mxu0 }
  0xdf   :  { %v706_v50 = vpop.f32.mrb[5].mxu0  ;;  %v1072_v51 = vpack.c.bf16 %v397_v48, %v396_v44  ;;  %v380_v55 = vmax.f32 %v224_v47, 0.0 }
  0xe0   :  { %v314_v52 = vpop.f32.mrb[4].mxu1 }
  0xe1   :  { %v760_v54 = vpop.f32.mrb[5].mxu1  ;;  %v398_v58 = vmax.f32 %v314_v52, 0.0 }
  0xe2   :  { %v229_v53 = vpop.f32.mrb[6].mxu0 }
  0xe3   :  { %v381_v56 = vmax.f32 %v229_v53, 0.0  ;;  %v709_v57 = vpop.f32.mrb[7].mxu0 }
  0xe4   :  { %v319_v60 = vpop.f32.mrb[6].mxu1 }
  0xe5   :  { %v1074_v59 = vpack.c.bf16 %v381_v56, %v380_v55  ;;  %v399_v62 = vmax.f32 %v319_v60, 0.0  ;;  %v763_v63 = vpop.f32.mrb[7].mxu1 }
  0xe6   :  { %v234_v61 = vpop.f32.mrb[8].mxu0 }
  0xe7   :  { %v712_v1 = vpop.f32.mrb[9].mxu0  ;;  %v1076_v2 = vpack.c.bf16 %v399_v62, %v398_v58  ;;  %v382_v6 = vmax.f32 %v234_v61, 0.0 }
  0xe8   :  { %v324_v3 = vpop.f32.mrb[8].mxu1 }
  0xe9   :  { %v766_v5 = vpop.f32.mrb[9].mxu1  ;;  %v400_v9 = vmax.f32 %v324_v3, 0.0 }
  0xea   :  { %v239_v4 = vpop.f32.mrb[10].mxu0 }
  0xeb   :  { %v383_v7 = vmax.f32 %v239_v4, 0.0  ;;  %v715_v8 = vpop.f32.mrb[11].mxu0 }
  0xec   :  { %v329_v11 = vpop.f32.mrb[10].mxu1 }
  0xed   :  { %v1078_v10 = vpack.c.bf16 %v383_v7, %v382_v6  ;;  %v401_v13 = vmax.f32 %v329_v11, 0.0  ;;  %v769_v14 = vpop.f32.mrb[11].mxu1 }
  0xee   :  { %v244_v12 = vpop.f32.mrb[12].mxu0 }
  0xef   :  { %v718_v15 = vpop.f32.mrb[13].mxu0  ;;  %v1080_v16 = vpack.c.bf16 %v401_v13, %v400_v9  ;;  %v384_v20 = vmax.f32 %v244_v12, 0.0 }
  0xf0   :  { %v334_v17 = vpop.f32.mrb[12].mxu1 }
  0xf1   :  { %v772_v19 = vpop.f32.mrb[13].mxu1  ;;  %v402_v23 = vmax.f32 %v334_v17, 0.0 }
  0xf2   :  { %v249_v18 = vpop.f32.mrb[14].mxu0 }
  0xf3   :  { %v385_v21 = vmax.f32 %v249_v18, 0.0  ;;  %v721_v22 = vpop.f32.mrb[15].mxu0 }
  0xf4   :  { %v339_v25 = vpop.f32.mrb[14].mxu1 }
  0xf5   :  { %v1082_v24 = vpack.c.bf16 %v385_v21, %v384_v20  ;;  %v403_v27 = vmax.f32 %v339_v25, 0.0  ;;  %v775_v28 = vpop.f32.mrb[15].mxu1 }
  0xf6   :  { %v254_v26 = vpop.f32.mrb[16].mxu0 }
  0xf7   :  { %v724_v29 = vpop.f32.mrb[17].mxu0  ;;  %v1084_v30 = vpack.c.bf16 %v403_v27, %v402_v23  ;;  %v386_v34 = vmax.f32 %v254_v26, 0.0 }
  0xf8   :  { %v344_v31 = vpop.f32.mrb[16].mxu1 }
  0xf9   :  { %v778_v33 = vpop.f32.mrb[17].mxu1  ;;  %v404_v37 = vmax.f32 %v344_v31, 0.0 }
  0xfa   :  { %v259_v32 = vpop.f32.mrb[18].mxu0 }
  0xfb   :  { %v387_v35 = vmax.f32 %v259_v32, 0.0  ;;  %v727_v36 = vpop.f32.mrb[19].mxu0 }
  0xfc   :  { %v349_v39 = vpop.f32.mrb[18].mxu1 }
  0xfd   :  { %v820_v38 = vpack.c.bf16 %v387_v35, %v386_v34  ;;  %v405_v41 = vmax.f32 %v349_v39, 0.0  ;;  %v781_v42 = vpop.f32.mrb[19].mxu1 }
  0xfe   :  { %v264_v40 = vpop.f32.mrb[20].mxu0 }
  0xff   :  { %v730_v43 = vpop.f32.mrb[21].mxu0  ;;  %v822_v44 = vpack.c.bf16 %v405_v41, %v404_v37  ;;  %v388_v49 = vmax.f32 %v264_v40, 0.0 }
 0x100   :  { %v354_v46 = vpop.f32.mrb[20].mxu1 }
 0x101   :  { %v784_v48 = vpop.f32.mrb[21].mxu1  ;;  %v406_v53 = vmax.f32 %v354_v46, 0.0 }
 0x102   :  { %v269_v47 = vpop.f32.mrb[22].mxu0 }
 0x103   :  { %v389_v50 = vmax.f32 %v269_v47, 0.0  ;;  %v733_v52 = vpop.f32.mrb[23].mxu0 }
 0x104   :  { %v359_v55 = vpop.f32.mrb[22].mxu1 }
 0x105   :  { %v824_v54 = vpack.c.bf16 %v389_v50, %v388_v49  ;;  %v407_v57 = vmax.f32 %v359_v55, 0.0  ;;  %v787_v58 = vpop.f32.mrb[23].mxu1 }
 0x106   :  { %v274_v56 = vpop.f32.mrb[24].mxu0 }
 0x107   :  { %v736_v60 = vpop.f32.mrb[25].mxu0  ;;  %v826_v61 = vpack.c.bf16 %v407_v57, %v406_v53  ;;  %v390_v3 = vmax.f32 %v274_v56, 0.0 }
 0x108   :  { %v364_v62 = vpop.f32.mrb[24].mxu1 }
 0x109   :  { %v790_v1 = vpop.f32.mrb[25].mxu1  ;;  %v408_v6 = vmax.f32 %v364_v62, 0.0 }
 0x10a   :  { %v279_v63 = vpop.f32.mrb[26].mxu0 }
 0x10b   :  { %v391_v4 = vmax.f32 %v279_v63, 0.0  ;;  %v739_v5 = vpop.f32.mrb[27].mxu0 }
 0x10c   :  { %v369_v8 = vpop.f32.mrb[26].mxu1 }
 0x10d   :  { %v828_v7 = vpack.c.bf16 %v391_v4, %v390_v3  ;;  %v409_v11 = vmax.f32 %v369_v8, 0.0  ;;  %v793_v12 = vpop.f32.mrb[27].mxu1 }
 0x10e   :  { %v284_v9 = vpop.f32.mrb[28].mxu0 }
 0x10f   :  { %v742_v13 = vpop.f32.mrb[29].mxu0  ;;  %v830_v14 = vpack.c.bf16 %v409_v11, %v408_v6  ;;  %v392_v19 = vmax.f32 %v284_v9, 0.0 }
 0x110   :  { %v374_v15 = vpop.f32.mrb[28].mxu1 }
 0x111   :  { %v796_v18 = vpop.f32.mrb[29].mxu1 }
 0x112   :  { %v289_v17 = vpop.f32.mrb[30].mxu0 }
 0x113   :  { %v393_v20 = vmax.f32 %v289_v17, 0.0  ;;  %v745_v21 = vpop.f32.mrb[31].mxu0 }
 0x115   :  { %v832_v22 = vpack.c.bf16 %v393_v20, %v392_v19 }
 0x116   :  { %v294_v23 = vpop.f32.mrb[32].mxu0 }
 0x117   :  { %v748_v25 = vpop.f32.mrb[33].mxu0  ;;  %v394_v27 = vmax.f32 %v294_v23, 0.0 }
 0x11a   :  { %v299_v26 = vpop.f32.mrb[34].mxu0 }
 0x11b   :  { %v395_v28 = vmax.f32 %v299_v26, 0.0  ;;  %v751_v29 = vpop.f32.mrb[35].mxu0 }
 0x11d   :  { %v802_v31 = vpack.c.bf16 %v395_v28, %v394_v27 }
 0x11f   :  { %803 = vmatprep.subr.bf16.mxu1 %v802_v31 }
 0x120   :  { %805 = vmatpush3.bf16.msra.mxu1 %v1070_v45  ;;  %v410_v45 = vmax.f32 %v374_v15, 0.0 }
 0x121   :  { %807 = vmatprep.subr.bf16.mxu1 %v1072_v51  ;;  %v411_v51 = vld [vmem:[%s1111_s2] sm:$0xff] }
 0x124   :  { %809 = vmatpush3.bf16.msra.mxu1 %v1074_v59  ;;  %v413_v59 = vld [vmem:[%s1111_s2 + $0x10] sm:$0xff] }
 0x125   :  { %811 = vmatprep.subr.bf16.mxu1 %v1076_v2 }
 0x128   :  { %813 = vmatpush3.bf16.msra.mxu1 %v1078_v10 }
 0x129   :  { %815 = vmatprep.subr.bf16.mxu1 %v1080_v16  ;;  %v557_v16 = vlaneseq }
 0x12b   :  { %v558_v33 = vshrl.u32 %v557_v16, 7 }
 0x12c   :  { %817 = vmatpush3.bf16.msra.mxu1 %v1082_v24 }
 0x12d   :  { %819 = vmatprep.subr.bf16.mxu1 %v1084_v30  ;;  %v566_v36 = vsub.s32 0, %v558_v33  ;;  %vm559_vm2 = vcmp.lt.s32.totalorder %v558_v33, 2  ;;  %vm583_vm3 = vcmp.eq.s32.totalorder %v558_v33, 2 }
 0x130   :  { %821 = vmatpush3.bf16.msra.mxu1 %v820_v38 }
 0x131   :  { %823 = vmatprep.subr.bf16.mxu1 %v822_v44 }
 0x134   :  { %825 = vmatpush3.bf16.msra.mxu1 %v824_v54 }
 0x135   :  { %827 = vmatprep.subr.bf16.mxu1 %v826_v61 }
 0x138   :  { %829 = vmatpush3.bf16.msra.mxu1 %v828_v7 }
 0x139   :  { %831 = vmatprep.subr.bf16.mxu1 %v830_v14 }
 0x13c   :  { %833 = vmatpush3.bf16.msra.mxu1 %v832_v22 }
 0x13d   :  { %797 = vmatprep.subr.mxu1 %v842_v0 }
 0x13f   :  { %482 = vmatmul.mubr.f32.vlgmr.msra.gmra.mrb[30].mxu1 %v411_v51 }
 0x140   :  { %798 = vmatpush3.msra.mxu1 %v410_v45  ;;  %799 = vmatprep.mubr.msk.f32.mxu1 %vm843_vm1, %v842_v0 }
 0x143   :  { %800 = vmatmul.mubr.msk.f32.vlgmr.msra.gmra.mrb[32].mxu1 %vm48_vm0, %v413_v59 }
 0x212   :  { %v691_v2 = vpop.f32.mrb[30].mxu1 }
 0x213   :  { %v692_v10 = vpop.f32.mrb[31].mxu1 }
 0x214   :  { %v693_v24 = vadd.f32 %v692_v10, %v691_v2 }
 0x216   :  { %v553_v30 = vpop.f32.mrb[32].mxu1 }
 0x217   :  { %v554_v32 = vadd.f32 %v693_v24, %v553_v30  ;;  %v801_v34 = vpop.f32.mrb[33].mxu1 }
 0x219   :  { %v561_v35 = vrot.slane %v554_v32, 1  ;;  %v584_v48 = vsel %vm583_vm3, %v554_v32, 0.0 }
 0x21b   :  { %v563_v37 = vmax.f32 %v554_v32, %v561_v35 }
 0x21d   :  { %v567_v38 = vrot.slane %v563_v37, %v566_v36 }
 0x21f   :  { %v568_v0 = vsel %vm559_vm2, %v554_v32, %v567_v38 }
 0x220   :  { %v569_v39 = vsub.f32 %v568_v0, %v567_v38 }
 0x222   :  { %v570_v40 = vmul.f32 1.442695, %v569_v39 }
 0x224   :  { %838 = vpow2.f32 %v570_v40 }
 0x22e   :  { %v839_v41 = vpop.eup %838 }
 0x22f   :  { %v573_v42 = vrot.slane %v839_v41, 1 }
 0x231   :  { %v575_v43 = vadd.f32 %v839_v41, %v573_v42 }
 0x233   :  { %840 = vrcp.f32 %v575_v43 }
 0x23d   :  { %v841_v44 = vpop.eup %840 }
 0x23e   :  { %v581_v46 = vrot.slane %v841_v44, %v566_v36 }
 0x240   :  { %v582_v47 = vmul.f32 %v839_v41, %v581_v46 }
 0x242   :  { %v585_v49 = vsel %vm559_vm2, %v582_v47, %v584_v48 }
 0x243   :  { %586 = vst [vmem:[%s1112_s3] sm:$0xff] %v585_v49 }

</bundles_post_ra>
